<compile_context>
chip_gen: v5e
topology: v5e:2x2
jax: 0.10.0
libtpu: 0.0.40
codegen_flags: <defaults>
</compile_context>

<pallas_src>
import jax
import jax.numpy as jnp
from jax.experimental import pallas as pl
from jax.experimental.pallas import tpu as pltpu


def _round_up(x: int, m: int) -> int:
    return (x + m - 1) // m * m


def _make_dice_kernel(eps: float, rt: int):
    def dice_kernel(pred_ref, target_ref, out_ref, acc_i_ref, acc_d_ref):
        s = pl.program_id(1)
        n_s = pl.num_programs(1)

        # Load native-dtype tiles, compute in f32 (works for bf16 inputs too).
        p = pred_ref[...].astype(jnp.float32)    # (RT, TS)
        t = target_ref[...].astype(jnp.float32)  # (RT, TS)

        prod = t * p
        sq = t * t + p * p

        # Deferred cross-lane reduction: pure VPU elementwise accumulation
        # across spatial steps; the XLU reduce happens only at finalize.
        @pl.when(s == 0)
        def _():
            acc_i_ref[...] = prod
            acc_d_ref[...] = sq

        @pl.when(s > 0)
        def _():
            acc_i_ref[...] += prod
            acc_d_ref[...] += sq

        # Finalize once per row block: reduce to per-row scalars, exact divide.
        @pl.when(s == n_s - 1)
        def _():
            inter = jnp.sum(acc_i_ref[...], axis=-1, keepdims=True)          # (RT, 1)
            dn = jnp.sum(acc_d_ref[...], axis=-1, keepdims=True) + jnp.float32(eps)
            dice = 2.0 * inter / dn                                          # (RT, 1)
            # Lane-dense (unmasked) store of the per-row dice values.
            out_ref[...] = jnp.broadcast_to(dice, (rt, 128))

    return dice_kernel


def dice_loss(
    pred: jax.Array,
    target: jax.Array,
    eps: float = 1e-6,
    *,
    max_spatial_tile: int = 16384,     # lanes per step (multiple of 128)
    max_tile_elems: int = 256 * 1024,  # per-input tile element budget (~1 MiB f32)
) -> jax.Array:
    """Pallas TPU implementation of DiceLoss(eps, dims=3).forward."""
    assert pred.shape == target.shape
    assert pred.ndim >= 4, "expect (B, C, *spatial) with dims=3 -> (B, C, D, H, W)"
    B, C = pred.shape[0], pred.shape[1]
    N = B * C
    S = 1
    for d in pred.shape[2:]:
        S *= d

    pred2 = pred.reshape(N, S)
    target2 = target.reshape(N, S)

    # --- choose lane-dense spatial tile TS (multiple of 128) ---
    S128 = _round_up(S, 128)
    TS = min(S128, max_spatial_tile)
    S_pad = _round_up(S, TS)

    # --- choose rows per step RT (multiple of 8), amortizes step overhead ---
    N8 = _round_up(N, 8)
    RT = max(8, (max_tile_elems // TS) // 8 * 8)
    RT = min(RT, N8)
    N_pad = _round_up(N, RT)

    # Zero-pad: padded spatial elements contribute 0 to both sums; padded
    # rows are sliced off before the final mean.
    if S_pad != S or N_pad != N:
        pred2 = jnp.pad(pred2, ((0, N_pad - N), (0, S_pad - S)))
        target2 = jnp.pad(target2, ((0, N_pad - N), (0, S_pad - S)))

    grid = (N_pad // RT, S_pad // TS)
    in_spec = pl.BlockSpec((RT, TS), lambda r, s: (r, s))
    out_spec = pl.BlockSpec((RT, 128), lambda r, s: (r, 0))

    out = pl.pallas_call(
        _make_dice_kernel(eps, RT),
        out_shape=jax.ShapeDtypeStruct((N_pad, 128), jnp.float32),
        grid_spec=pltpu.PrefetchScalarGridSpec(
            num_scalar_prefetch=0,
            grid=grid,
            in_specs=[in_spec, in_spec],
            out_specs=out_spec,
            scratch_shapes=[
                pltpu.VMEM((RT, TS), jnp.float32),  # intersection accumulator
                pltpu.VMEM((RT, TS), jnp.float32),  # t^2 + p^2 accumulator
            ],
        ),
        compiler_params=pltpu.CompilerParams(
            dimension_semantics=("parallel", "arbitrary"),
            vmem_limit_bytes=32 * 1024 * 1024,  # safe on v5e/v6e/v7x, ample headroom
        ),
    )(pred2, target2)

    # Tiny epilogue in plain JAX: -mean over the real (B, C) rows.
    dice_rows = out[:N, 0]
    return -jnp.mean(dice_rows)


def dice_loss_ref(pred, target, eps=1e-6):
    inter = jnp.sum(target * pred, axis=(-3, -2, -1))
    dn = jnp.sum(target * target + pred * pred, axis=(-3, -2, -1)) + eps
    return -jnp.mean(2.0 * inter / dn, axis=(0, 1))


if __name__ == "__main__":
    key = jax.random.PRNGKey(0)
    k1, k2 = jax.random.split(key)
    B, C, D, H, W = 2, 4, 4, 8, 16
    pred = jax.nn.sigmoid(jax.random.normal(k1, (B, C, D, H, W), jnp.float32))
    target = (jax.random.uniform(k2, (B, C, D, H, W), jnp.float32) > 0.5).astype(
        jnp.float32
    )

    out = dice_loss(pred, target)
    out = jax.block_until_ready(out)

    ref = dice_loss_ref(pred, target)
    assert jnp.allclose(out, ref, rtol=1e-5, atol=1e-6), (out, ref)
    print("KERNEL_OK")
</pallas_src>

<mosaic_0001>
module attributes {stable_mosaic.version = 11 : i64} {
  func.func @dice_kernel(%arg0: i32, %arg1: i32, %arg2: memref<8x512xf32, #tpu.memory_space<vmem>>, %arg3: memref<8x512xf32, #tpu.memory_space<vmem>>, %arg4: memref<8x128xf32, #tpu.memory_space<vmem>>, %arg5: memref<8x512xf32, #tpu.memory_space<vmem>>, %arg6: memref<8x512xf32, #tpu.memory_space<vmem>>) attributes {dimension_semantics = [#tpu.dimension_semantics<parallel>, #tpu.dimension_semantics<arbitrary>], iteration_bounds = array<i64: 1, 1>, scalar_prefetch = 0 : i64, scratch_operands = 2 : i64, tpu.core_type = #tpu.core_type<tc>, window_params = [{transform_indices = @transform_0, window_bounds = array<i64: 8, 512>}, {transform_indices = @transform_1, window_bounds = array<i64: 8, 512>}, {transform_indices = @transform_2, window_bounds = array<i64: 8, 128>}]} {
    %c0 = arith.constant 0 : index
    %c0_0 = arith.constant 0 : index
    %0 = vector.load %arg2[%c0, %c0_0] : memref<8x512xf32, #tpu.memory_space<vmem>>, vector<8x512xf32>
    %c0_1 = arith.constant 0 : index
    %c0_2 = arith.constant 0 : index
    %1 = vector.load %arg3[%c0_1, %c0_2] : memref<8x512xf32, #tpu.memory_space<vmem>>, vector<8x512xf32>
    %2 = arith.mulf %1, %0 : vector<8x512xf32>
    %3 = arith.mulf %1, %1 : vector<8x512xf32>
    %4 = arith.mulf %0, %0 : vector<8x512xf32>
    %5 = arith.addf %3, %4 : vector<8x512xf32>
    %c0_i32 = arith.constant 0 : i32
    %6 = arith.cmpi eq, %arg1, %c0_i32 : i32
    %7 = arith.extui %6 : i1 to i32
    %c0_i32_3 = arith.constant 0 : i32
    %8 = arith.cmpi ne, %7, %c0_i32_3 : i32
    scf.if %8 {
      %c0_8 = arith.constant 0 : index
      %c0_9 = arith.constant 0 : index
      %15 = vector.load %arg5[%c0_8, %c0_9] : memref<8x512xf32, #tpu.memory_space<vmem>>, vector<8x512xf32>
      tpu.vector_store %arg5[%c0_8, %c0_9], %2 {strides = array<i32>} : memref<8x512xf32, #tpu.memory_space<vmem>>, vector<8x512xf32>,
      %c0_10 = arith.constant 0 : index
      %c0_11 = arith.constant 0 : index
      %16 = vector.load %arg6[%c0_10, %c0_11] : memref<8x512xf32, #tpu.memory_space<vmem>>, vector<8x512xf32>
      tpu.vector_store %arg6[%c0_10, %c0_11], %5 {strides = array<i32>} : memref<8x512xf32, #tpu.memory_space<vmem>>, vector<8x512xf32>,
    } else {
    }
    %c0_i32_4 = arith.constant 0 : i32
    %9 = arith.cmpi sgt, %arg1, %c0_i32_4 : i32
    %10 = arith.extui %9 : i1 to i32
    %c0_i32_5 = arith.constant 0 : i32
    %11 = arith.cmpi ne, %10, %c0_i32_5 : i32
    scf.if %11 {
      %c0_8 = arith.constant 0 : index
      %c0_9 = arith.constant 0 : index
      %15 = vector.load %arg5[%c0_8, %c0_9] : memref<8x512xf32, #tpu.memory_space<vmem>>, vector<8x512xf32>
      %16 = arith.addf %15, %2 : vector<8x512xf32>
      %c0_10 = arith.constant 0 : index
      %c0_11 = arith.constant 0 : index
      %17 = vector.load %arg5[%c0_10, %c0_11] : memref<8x512xf32, #tpu.memory_space<vmem>>, vector<8x512xf32>
      tpu.vector_store %arg5[%c0_10, %c0_11], %16 {strides = array<i32>} : memref<8x512xf32, #tpu.memory_space<vmem>>, vector<8x512xf32>,
      %c0_12 = arith.constant 0 : index
      %c0_13 = arith.constant 0 : index
      %18 = vector.load %arg6[%c0_12, %c0_13] : memref<8x512xf32, #tpu.memory_space<vmem>>, vector<8x512xf32>
      %19 = arith.addf %18, %5 : vector<8x512xf32>
      %c0_14 = arith.constant 0 : index
      %c0_15 = arith.constant 0 : index
      %20 = vector.load %arg6[%c0_14, %c0_15] : memref<8x512xf32, #tpu.memory_space<vmem>>, vector<8x512xf32>
      tpu.vector_store %arg6[%c0_14, %c0_15], %19 {strides = array<i32>} : memref<8x512xf32, #tpu.memory_space<vmem>>, vector<8x512xf32>,
    } else {
    }
    %c0_i32_6 = arith.constant 0 : i32
    %12 = arith.cmpi eq, %arg1, %c0_i32_6 : i32
    %13 = arith.extui %12 : i1 to i32
    %c0_i32_7 = arith.constant 0 : i32
    %14 = arith.cmpi ne, %13, %c0_i32_7 : i32
    scf.if %14 {
      %c0_8 = arith.constant 0 : index
      %c0_9 = arith.constant 0 : index
      %15 = vector.load %arg5[%c0_8, %c0_9] : memref<8x512xf32, #tpu.memory_space<vmem>>, vector<8x512xf32>
      %cst = arith.constant dense<0.000000e+00> : vector<8xf32>
      %16 = vector.multi_reduction <add>, %15, %cst [1] : vector<8x512xf32> to vector<8xf32>
      %17 = vector.shape_cast %16 : vector<8xf32> to vector<8x1xf32>
      %c0_10 = arith.constant 0 : index
      %c0_11 = arith.constant 0 : index
      %18 = vector.load %arg6[%c0_10, %c0_11] : memref<8x512xf32, #tpu.memory_space<vmem>>, vector<8x512xf32>
      %cst_12 = arith.constant dense<0.000000e+00> : vector<8xf32>
      %19 = vector.multi_reduction <add>, %18, %cst_12 [1] : vector<8x512xf32> to vector<8xf32>
      %20 = vector.shape_cast %19 : vector<8xf32> to vector<8x1xf32>
      %cst_13 = arith.constant 9.99999997E-7 : f32
      %21 = vector.broadcast %cst_13 : f32 to vector<8x1xf32>
      %22 = arith.addf %20, %21 : vector<8x1xf32>
      %cst_14 = arith.constant 2.000000e+00 : f32
      %23 = vector.broadcast %cst_14 : f32 to vector<8x1xf32>
      %24 = arith.mulf %23, %17 : vector<8x1xf32>
      %25 = arith.divf %24, %22 : vector<8x1xf32>
      %26 = vector.shape_cast %25 : vector<8x1xf32> to vector<8x1xf32>
      %27 = vector.broadcast %26 : vector<8x1xf32> to vector<8x128xf32>
      %c0_15 = arith.constant 0 : index
      %c0_16 = arith.constant 0 : index
      %28 = vector.load %arg4[%c0_15, %c0_16] : memref<8x128xf32, #tpu.memory_space<vmem>>, vector<8x128xf32>
      tpu.vector_store %arg4[%c0_15, %c0_16], %27 {strides = array<i32>} : memref<8x128xf32, #tpu.memory_space<vmem>>, vector<8x128xf32>,
    } else {
    }
    return
  }
  func.func @transform_0(%arg0: i32, %arg1: i32) -> (i32, i32) {
    %c0_i32 = arith.constant 0 : i32
    return %arg0, %arg1 : i32, i32
  }
  func.func @transform_1(%arg0: i32, %arg1: i32) -> (i32, i32) {
    %c0_i32 = arith.constant 0 : i32
    return %arg0, %arg1 : i32, i32
  }
  func.func @transform_2(%arg0: i32, %arg1: i32) -> (i32, i32) {
    %c0_i32 = arith.constant 0 : i32
    %c0_i32_0 = arith.constant 0 : i32
    return %arg0, %c0_i32 : i32, i32
  }
}

</mosaic_0001>

<bundles_post_ra>
// kernel: tpu_custom_call.1
= control target key start
LH: loop header
LB: loop body
LE: loop exit
PB: predicated region body
PF: predicated region fallthrough
CT: control target
= control target key end

     0   :  { %7 = vsyncpa [#allocation5], 0  ;;  %s271_s0 = inlined_call_operand.hbm [shape: f32[8,512], index: 0, kind: input, shape index: {}]   ;;  %s272_s1 = inlined_call_operand.hbm [shape: f32[8,512], index: 1, kind: input, shape index: {}]   ;;  %s273_s2 = inlined_call_operand.hbm [shape: f32[8,128], index: 2, kind: output, shape index: {}]  }
   0x1   :  { %8 = vsyncpa [#allocation8], 0 }
   0x2   :  { %9 = vsyncpa [#allocation6], 0  ;;  %s15_s11 = sshll.u32 %s271_s0, 4  ;;  %s244_s12 = smov [#allocation4]   ;;  %s16_s11 = int_to_ptr.hbm [resolvable:$true] %s15_s11 }
   0x3   :  { %s17_s13 = sshll.u32 %s244_s12, 4  ;;  %s26_s16 = sshll.u32 %s272_s1, 4  ;;  %s18_s13 = int_to_ptr.vmem [resolvable:$true] %s17_s13  ;;  %s27_s16 = int_to_ptr.hbm [resolvable:$true] %s26_s16 }
   0x4   :  { %20 = dma.hbm_to_vmem [thread:$0]  %s16_s11, 512, %s18_s13, [#allocation5]  }
   0x5   :  { %s245_s17 = smov [#allocation7]  }
   0x6   :  { %s28_s18 = sshll.u32 %s245_s17, 4  ;;  %s29_s18 = int_to_ptr.vmem [resolvable:$true] %s28_s18 }
   0x7   :  { %31 = dma.hbm_to_vmem [thread:$0]  %s27_s16, 512, %s29_s18, [#allocation8]  }
   0x8   :  { %238 = dma.done.wait [#allocation5], 512  }
   0x9   :  { %239 = vsyncadd [#allocation5], 4294966784 }
   0xa   :  { %240 = dma.done.wait [#allocation8], 512  }
   0xb   :  { %241 = vsyncadd [#allocation8], 4294966784  ;;  %v40_v0 = vld [vmem:[#allocation4] sm:$0xff]  ;;  %v41_v1 = vld [vmem:[#allocation4 + $0x8] sm:$0xff]  ;;  %s246_s0 = smov [#allocation9]   ;;  %s150_s21 = sshll.u32 %s273_s2, 4  ;;  %s151_s21 = int_to_ptr.hbm [resolvable:$true] %s150_s21 }
   0xc   :  { %v42_v2 = vld [vmem:[#allocation4 + $0x10] sm:$0xff]  ;;  %v43_v3 = vld [vmem:[#allocation4 + $0x18] sm:$0xff]  ;;  %v44_v4 = vld [vmem:[#allocation7] sm:$0xff]  ;;  %v56_v6 = vmul.f32 %v40_v0, %v40_v0  ;;  %v57_v7 = vmul.f32 %v41_v1, %v41_v1  ;;  %s148_s1 = sshll.u32 %s246_s0, 4  ;;  %s149_s1 = int_to_ptr.vmem [resolvable:$true] %s148_s1 }
   0xd   :  { %v45_v5 = vld [vmem:[#allocation7 + $0x8] sm:$0xff]  ;;  %v58_v8 = vmul.f32 %v42_v2, %v42_v2  ;;  %v46_v9 = vld [vmem:[#allocation7 + $0x10] sm:$0xff]  ;;  %v47_v10 = vld [vmem:[#allocation7 + $0x18] sm:$0xff]  ;;  %v52_v11 = vmul.f32 %v44_v4, %v44_v4  ;;  %v59_v13 = vmul.f32 %v43_v3, %v43_v3  ;;  %v48_v18 = vmul.f32 %v44_v4, %v40_v0 }
   0xe   :  { %v53_v12 = vmul.f32 %v45_v5, %v45_v5  ;;  %v54_v14 = vmul.f32 %v46_v9, %v46_v9  ;;  %v55_v15 = vmul.f32 %v47_v10, %v47_v10  ;;  %v49_v19 = vmul.f32 %v45_v5, %v41_v1 }
   0xf   :  { %v60_v16 = vadd.f32 %v56_v6, %v52_v11  ;;  %v50_v24 = vmul.f32 %v46_v9, %v42_v2  ;;  %v51_v27 = vmul.f32 %v47_v10, %v43_v3 }
  0x10   :  { %v61_v17 = vadd.f32 %v57_v7, %v53_v12  ;;  %v62_v20 = vadd.f32 %v58_v8, %v54_v14  ;;  %v63_v21 = vadd.f32 %v59_v13, %v55_v15  ;;  %v111_v25 = vadd.f32 %v49_v19, %v48_v18 }
  0x12   :  { %v120_v22 = vadd.f32 %v61_v17, %v60_v16  ;;  %v112_v28 = vadd.f32 %v111_v25, %v50_v24 }
  0x14   :  { %v121_v23 = vadd.f32 %v120_v22, %v62_v20  ;;  %v113_v29 = vadd.f32 %v112_v28, %v51_v27 }
  0x16   :  { %v122_v26 = vadd.f32 %v121_v23, %v63_v21 }
  0x18   :  { %123 = vadd.xlane.f32.xlu0 %v122_v26 }
  0x20   :  { %114 = vadd.xlane.f32.xlu0 %v113_v29 }
  0x8b   :  { %v124_v30 = vpop.xlane.xlu0 %123 }
  0x8c   :  { %v125_v31 = vadd.f32 1e-06, %v124_v30 }
  0x8e   :  { %164 = vrcp.f32 %v125_v31  ;;  %v138_v35 = vand.u32 2147483648, %v125_v31  ;;  %v136_v38 = vand.u32 2147483647, %v125_v31  ;;  %vm132_vm1 = vweird.f32 %v125_v31 }
  0x90   :  { %v139_v41 = vor.u32 1.1754944e-38, %v138_v35  ;;  %vm137_vm3 = vcmp.eq.f32.partialorder %v136_v38, 8.507059e+37 }
  0x93   :  { %v115_v36 = vpop.xlane.xlu0 %114 }
  0x94   :  { %v165_v32 = vpop.eup %164  ;;  %v126_v40 = vmul.f32 2.0, %v115_v36 }
  0x95   :  { %v128_v33 = vmul.f32 %v165_v32, %v125_v31  ;;  %vm133_vm0 = vweird.f32 %v165_v32 }
  0x96   :  { %vm134_vm2 = vmor %vm132_vm1, %vm133_vm0 }
  0x97   :  { %v129_v34 = vsub.f32 1.0, %v128_v33 }
  0x99   :  { %v130_v37 = vmul.f32 %v165_v32, %v129_v34 }
  0x9b   :  { %v131_v39 = vadd.f32 %v165_v32, %v130_v37 }
  0x9d   :  { %v135_v42 = vsel %vm134_vm2, %v165_v32, %v131_v39 }
  0x9e   :  { %v140_v43 = vsel %vm137_vm3, %v139_v41, %v135_v42 }
  0x9f   :  { %v141_v44 = vmul.f32 %v140_v43, %v126_v40 }
  0xa1   :  { %142 = vst [vmem:[#allocation9] sm:$0xff] %v141_v44 }
  0xa2   :  { %153 = dma.vmem_to_hbm [thread:$0]  %s149_s1, 128, %s151_s21, [#allocation6]  }
  0xa3   :  { %242 = dma.done.wait [#allocation6], 128  }
  0xa4   :  { %243 = vsyncadd [#allocation6], 4294967168 }
  0xa5   :  { %158 = vsyncpa [#allocation5], 1 }
  0xa6   :  { %159 = vsyncpa [#allocation8], 1 }
  0xa7   :  { %160 = vsyncpa [#allocation6], 1 }

</bundles_post_ra>
